<compile_context>
chip_gen: v6e
topology: v6e:2x2x1
jax: 0.10.0
libtpu: 0.0.40
codegen_flags: <defaults>
</compile_context>

<pallas_src>
import functools

import jax
import jax.numpy as jnp
import numpy as np
from jax.experimental import pallas as pl
from jax.experimental.pallas import tpu as pltpu


def _elu(x):
    # F.elu with alpha=1.0; clamp the exp argument so garbage values in padded
    # rows of the ragged final block cannot overflow.
    return jnp.where(x > 0, x, jnp.exp(jnp.minimum(x, 0.0)) - 1.0)


def mi_net_zc_kernel(
    z_ref, c_ref, cr_ref,            # (TILE_NF, FOLD*D) folded row blocks
    w1_ref, b1_ref,                  # folded fused layer 1: (FOLD*D, FOLD*2H), (1, FOLD*2H)
    w2_ref, b2_ref,                  # folded block-diag layer 2: (FOLD*2H, 2*FOLD*D), (1, 2*FOLD*D)
    part_ref,                        # (1, 8, 128) partial-sum block
    *, tile_nf, n_rows, fold, embed_dim,
):
    i = pl.program_id(0)
    df = fold * embed_dim            # folded lane width (128 for D=32)

    z = z_ref[...]                                  # matmul dtype (bf16/f32)
    c = c_ref[...].astype(jnp.float32)
    c_rand = cr_ref[...].astype(jnp.float32)

    # ---- layer 1 (mu|var, 4x block-diag folded): (TILE_NF, FOLD*2H) ----------
    h = jnp.dot(z, w1_ref[...], preferred_element_type=jnp.float32) + b1_ref[...]
    h = _elu(h)

    # ---- layer 2 (block-diag folded): (TILE_NF, 2*FOLD*D) = [mu | pre_logvar] -
    out2 = (
        jnp.dot(h.astype(w2_ref.dtype), w2_ref[...],
                preferred_element_type=jnp.float32)
        + b2_ref[...]
    )
    mu = out2[:, :df]
    logvar = jnp.tanh(out2[:, df:])

    # ---- mi_loss terms (all f32, full 128-lane width) -------------------------
    inv_var = jnp.exp(-logvar)                      # 1 / exp(logvar)
    t_pos = (mu - c) ** 2 * inv_var                 # reused by lld and bound
    t_neg = (mu - c_rand) ** 2 * inv_var
    lld_term = -t_pos - logvar
    bound_term = t_neg - t_pos

    def write(lld_p, bound_p):
        # Lane-dense (8,128) output block: [0,0] = lld partial, [0,1] = bound.
        lane = jax.lax.broadcasted_iota(jnp.int32, (8, 128), 1)
        part_ref[0] = jnp.where(lane == 0, lld_p,
                                jnp.where(lane == 1, bound_p, 0.0))

    padded = (n_rows % (fold * tile_nf)) != 0       # static Python bool
    if padded:
        last = pl.num_programs(0) - 1

        @pl.when(i == last)
        def _():
            # Mask padded logical rows (zero-padded or OOB garbage) — only the
            # final grid step pays for this.
            row = jax.lax.broadcasted_iota(jnp.int32, (tile_nf, df), 0)
            lane = jax.lax.broadcasted_iota(jnp.int32, (tile_nf, df), 1)
            logical = (i * tile_nf + row) * fold + lane // embed_dim
            valid = logical < n_rows
            write(jnp.sum(jnp.where(valid, lld_term, 0.0)),
                  jnp.sum(jnp.where(valid, bound_term, 0.0)))

        @pl.when(i != last)
        def _():
            write(jnp.sum(lld_term), jnp.sum(bound_term))
    else:
        write(jnp.sum(lld_term), jnp.sum(bound_term))


@functools.partial(
    jax.jit, static_argnames=("max_tile", "matmul_dtype", "stream_dtype"))
def mi_net_zc(output_emb_z, output_emb_c, output_emb_c_rand, params,
              max_tile=2048, matmul_dtype=jnp.bfloat16,
              stream_dtype=jnp.float32):
    """Runs the 'zc' branch of Mi_Net.forward + mi_loss as one Pallas kernel.

    max_tile is in *folded* rows (one folded row = `fold` logical rows).
    stream_dtype=jnp.bfloat16 halves c/c_rand HBM traffic (mainly useful on
    v5e); keep f32 where 1e-3 parity with the f32 loss math matters.
    """
    n, d = output_emb_z.shape
    hidden = params["w_mu1"].shape[1]               # embed_dim // 2
    h2 = 2 * hidden                                 # per-logical-row layer-1 width

    # ---- lane-dense fold: pack `fold` logical rows into one 128-lane row -----
    fold = (128 // d) if (d <= 128 and 128 % d == 0) else 1
    df = fold * d
    h2f = fold * h2
    d2f = 2 * df

    n4 = -(-n // fold) * fold                       # pad N to a multiple of fold
    nf = n4 // fold                                 # folded row count
    if n4 != n:
        pad = n4 - n
        z_p = jnp.pad(output_emb_z, ((0, pad), (0, 0)))
        c_p = jnp.pad(output_emb_c, ((0, pad), (0, 0)))
        cr_p = jnp.pad(output_emb_c_rand, ((0, pad), (0, 0)))
    else:
        z_p, c_p, cr_p = output_emb_z, output_emb_c, output_emb_c_rand

    z = z_p.reshape(nf, df).astype(matmul_dtype)
    c = c_p.reshape(nf, df).astype(stream_dtype)
    c_rand = cr_p.reshape(nf, df).astype(stream_dtype)

    # ---- tile selection: big tiles, but >= 2 grid steps for v7x megacore -----
    if nf <= 8:
        tile_nf = nf                                # single full-extent block
    else:
        target = min(max_tile, -(-nf // 2))         # aim for >= 2 steps
        tile_nf = max(8, -(-target // 8) * 8)       # multiple of 8 (sublanes)
    g = -(-nf // tile_nf)

    # ---- fuse + fold parameters (cheap; folded by jit) ------------------------
    w1f = jnp.concatenate([params["w_mu1"], params["w_var1"]], axis=1)   # (d, 2h)
    b1f = jnp.concatenate([params["b_mu1"], params["b_var1"]], axis=1)   # (1, 2h)

    w1 = jnp.zeros((df, h2f), jnp.float32)
    w2 = jnp.zeros((h2f, d2f), jnp.float32)
    for k in range(fold):
        w1 = w1.at[k * d:(k + 1) * d, k * h2:(k + 1) * h2].set(w1f)
        w2 = w2.at[k * h2:k * h2 + hidden, k * d:(k + 1) * d].set(params["w_mu2"])
        w2 = w2.at[k * h2 + hidden:(k + 1) * h2,
                   df + k * d:df + (k + 1) * d].set(params["w_var2"])
    b1 = jnp.tile(b1f, (1, fold))                                        # (1, h2f)
    b2 = jnp.concatenate([jnp.tile(params["b_mu2"], (1, fold)),
                          jnp.tile(params["b_var2"], (1, fold))], axis=1)  # (1, d2f)
    w1 = w1.astype(matmul_dtype)
    w2 = w2.astype(matmul_dtype)

    kernel = functools.partial(
        mi_net_zc_kernel, tile_nf=tile_nf, n_rows=n, fold=fold, embed_dim=d)

    z_bytes = np.dtype(matmul_dtype).itemsize
    c_bytes = np.dtype(stream_dtype).itemsize
    cost = pl.CostEstimate(
        flops=2 * nf * (df * h2f + h2f * d2f),
        transcendentals=nf * (h2f + 2 * df),
        bytes_accessed=(nf * df * (z_bytes + 2 * c_bytes)
                        + (w1.size + w2.size) * z_bytes
                        + (b1.size + b2.size) * 4
                        + g * 8 * 128 * 4),
    )

    parts = pl.pallas_call(
        kernel,
        out_shape=jax.ShapeDtypeStruct((g, 8, 128), jnp.float32),
        grid=(g,),
        in_specs=[
            pl.BlockSpec((tile_nf, df), lambda i: (i, 0)),    # z (streamed)
            pl.BlockSpec((tile_nf, df), lambda i: (i, 0)),    # c (streamed)
            pl.BlockSpec((tile_nf, df), lambda i: (i, 0)),    # c_rand (streamed)
            pl.BlockSpec((df, h2f), lambda i: (0, 0)),        # w1 (resident)
            pl.BlockSpec((1, h2f), lambda i: (0, 0)),         # b1 (resident)
            pl.BlockSpec((h2f, d2f), lambda i: (0, 0)),       # w2 (resident)
            pl.BlockSpec((1, d2f), lambda i: (0, 0)),         # b2 (resident)
        ],
        out_specs=pl.BlockSpec((1, 8, 128), lambda i: (i, 0, 0)),
        compiler_params=pltpu.CompilerParams(
            dimension_semantics=("parallel",),
            vmem_limit_bytes=32 * 1024 * 1024,
        ),
        cost_estimate=cost,
    )(z, c, c_rand, w1, b1, w2, b2)

    # Final tiny reduction over per-block partials in plain JAX.
    lld = jnp.sum(parts[:, 0, 0]) / n
    bound = jnp.sum(parts[:, 0, 1]) / n / 2.0
    return -lld, bound


def init_linear(key, fan_in, fan_out):
    """PyTorch nn.Linear default init: U(-1/sqrt(fan_in), 1/sqrt(fan_in)).
    Weight returned as (in, out), bias as (1, out)."""
    kw, kb = jax.random.split(key)
    bound = 1.0 / np.sqrt(fan_in)
    w = jax.random.uniform(kw, (fan_in, fan_out), jnp.float32, -bound, bound)
    b = jax.random.uniform(kb, (1, fan_out), jnp.float32, -bound, bound)
    return w, b


def reference_zc(z, c, c_rand, p, matmul_dtype=jnp.bfloat16):
    """Pure-JAX reference mirroring the kernel's matmul precision."""
    def mm(a, w):
        return jnp.dot(a.astype(matmul_dtype), w.astype(matmul_dtype),
                       preferred_element_type=jnp.float32)

    h_mu = _elu(mm(z, p["w_mu1"]) + p["b_mu1"])
    mu = mm(h_mu, p["w_mu2"]) + p["b_mu2"]
    h_var = _elu(mm(z, p["w_var1"]) + p["b_var1"])
    logvar = jnp.tanh(mm(h_var, p["w_var2"]) + p["b_var2"])

    pos = -((mu - c) ** 2) / jnp.exp(logvar)
    neg = -((mu - c_rand) ** 2) / jnp.exp(logvar)
    lld = (pos - logvar).sum(axis=1).mean(axis=0)
    bound = jnp.mean(jnp.sum(pos, axis=-1) - jnp.sum(neg, axis=-1)) / 2.0
    return -lld, bound


def _run_case(key, num_nodes, embed_dim, params, max_tile,
              matmul_dtype=jnp.bfloat16):
    k_z, k_c, k_perm = jax.random.split(key, 3)
    # Stand-in for rep_u(nodes) -> (output_emb_z, output_emb_c, _)
    z = jax.random.normal(k_z, (num_nodes, embed_dim), jnp.float32)
    c = jax.random.normal(k_c, (num_nodes, embed_dim), jnp.float32)
    # torch.randperm(len(nodes)) -> deterministic permutation; gather in glue.
    new_order = jax.random.permutation(k_perm, num_nodes)
    c_rand = c[new_order]

    neg_lld, bound = mi_net_zc(z, c, c_rand, params, max_tile=max_tile,
                               matmul_dtype=matmul_dtype)
    jax.block_until_ready((neg_lld, bound))

    ref_neg_lld, ref_bound = reference_zc(z, c, c_rand, params,
                                          matmul_dtype=matmul_dtype)
    np.testing.assert_allclose(np.asarray(neg_lld), np.asarray(ref_neg_lld),
                               rtol=1e-3, atol=1e-3)
    np.testing.assert_allclose(np.asarray(bound), np.asarray(ref_bound),
                               rtol=1e-3, atol=1e-3)


if __name__ == "__main__":
    embed_dim = 32
    hidden = embed_dim // 2

    key = jax.random.PRNGKey(0)
    k_data1, k_data2, k_data3, k1, k2, k3, k4 = jax.random.split(key, 7)

    w_mu1, b_mu1 = init_linear(k1, embed_dim, hidden)
    w_mu2, b_mu2 = init_linear(k2, hidden, embed_dim)
    w_var1, b_var1 = init_linear(k3, embed_dim, hidden)
    w_var2, b_var2 = init_linear(k4, hidden, embed_dim)
    params = dict(
        w_mu1=w_mu1, b_mu1=b_mu1, w_mu2=w_mu2, b_mu2=b_mu2,
        w_var1=w_var1, b_var1=b_var1, w_var2=w_var2, b_var2=b_var2,
    )

    # Small case: single full-extent folded block, no masking.
    _run_case(k_data1, num_nodes=8, embed_dim=embed_dim, params=params,
              max_tile=2048)

    # Tiled grid (several steps) + ragged-final-block masking path (bf16 MXU).
    _run_case(k_data2, num_nodes=300, embed_dim=embed_dim, params=params,
              max_tile=16)

    # N not a multiple of the fold (exercises wrapper padding) with exact f32
    # matmul semantics against an f32 reference.
    _run_case(k_data3, num_nodes=301, embed_dim=embed_dim, params=params,
              max_tile=2048, matmul_dtype=jnp.float32)

    print("KERNEL_OK")
</pallas_src>

<mosaic_0001>
module attributes {stable_mosaic.version = 11 : i64} {
  func.func @mi_net_zc_kernel(%arg0: i32, %arg1: memref<2x128xbf16, #tpu.memory_space<vmem>>, %arg2: memref<2x128xf32, #tpu.memory_space<vmem>>, %arg3: memref<2x128xf32, #tpu.memory_space<vmem>>, %arg4: memref<128x128xbf16, #tpu.memory_space<vmem>>, %arg5: memref<1x128xf32, #tpu.memory_space<vmem>>, %arg6: memref<128x256xbf16, #tpu.memory_space<vmem>>, %arg7: memref<1x256xf32, #tpu.memory_space<vmem>>, %arg8: memref<1x8x128xf32, #tpu.memory_space<vmem>>) attributes {dimension_semantics = [#tpu.dimension_semantics<parallel>], iteration_bounds = array<i64: 1>, scalar_prefetch = 0 : i64, scratch_operands = 0 : i64, tpu.core_type = #tpu.core_type<tc>, window_params = [{transform_indices = @transform_0, window_bounds = array<i64: 2, 128>}, {transform_indices = @transform_1, window_bounds = array<i64: 2, 128>}, {transform_indices = @transform_2, window_bounds = array<i64: 2, 128>}, {pipeline_mode = #tpu.pipeline_mode<synchronous>, transform_indices = @transform_3, window_bounds = array<i64: 128, 128>}, {pipeline_mode = #tpu.pipeline_mode<synchronous>, transform_indices = @transform_4, window_bounds = array<i64: 1, 128>}, {pipeline_mode = #tpu.pipeline_mode<synchronous>, transform_indices = @transform_5, window_bounds = array<i64: 128, 256>}, {pipeline_mode = #tpu.pipeline_mode<synchronous>, transform_indices = @transform_6, window_bounds = array<i64: 1, 256>}, {transform_indices = @transform_7, window_bounds = array<i64: 1, 8, 128>}]} {
    %c0 = arith.constant 0 : index
    %c0_0 = arith.constant 0 : index
    %0 = vector.load %arg1[%c0, %c0_0] : memref<2x128xbf16, #tpu.memory_space<vmem>>, vector<2x128xbf16>
    %c0_1 = arith.constant 0 : index
    %c0_2 = arith.constant 0 : index
    %1 = vector.load %arg2[%c0_1, %c0_2] : memref<2x128xf32, #tpu.memory_space<vmem>>, vector<2x128xf32>
    %c0_3 = arith.constant 0 : index
    %c0_4 = arith.constant 0 : index
    %2 = vector.load %arg3[%c0_3, %c0_4] : memref<2x128xf32, #tpu.memory_space<vmem>>, vector<2x128xf32>
    %c0_5 = arith.constant 0 : index
    %c0_6 = arith.constant 0 : index
    %3 = vector.load %arg4[%c0_5, %c0_6] : memref<128x128xbf16, #tpu.memory_space<vmem>>, vector<128x128xbf16>
    %cst = arith.constant dense<0.000000e+00> : vector<2x128xf32>
    %4 = tpu.matmul %0, %3, %cst {dimension_numbers = #tpu.dot_dimension_numbers<[1], [0], [0], [1], [0, 0, 1, 1], [], []>} : vector<2x128xbf16>, vector<128x128xbf16>, vector<2x128xf32> -> vector<2x128xf32>
    %c0_7 = arith.constant 0 : index
    %c0_8 = arith.constant 0 : index
    %5 = vector.load %arg5[%c0_7, %c0_8] : memref<1x128xf32, #tpu.memory_space<vmem>>, vector<1x128xf32>
    %6 = vector.broadcast %5 : vector<1x128xf32> to vector<2x128xf32>
    %7 = arith.addf %4, %6 : vector<2x128xf32>
    %cst_9 = arith.constant 0.000000e+00 : f32
    %8 = vector.broadcast %cst_9 : f32 to vector<2x128xf32>
    %9 = arith.cmpf ogt, %7, %8 : vector<2x128xf32>
    %cst_10 = arith.constant 0.000000e+00 : f32
    %10 = vector.broadcast %cst_10 : f32 to vector<2x128xf32>
    %11 = arith.minimumf %7, %10 : vector<2x128xf32>
    %12 = math.exp %11 : vector<2x128xf32>
    %cst_11 = arith.constant 1.000000e+00 : f32
    %13 = vector.broadcast %cst_11 : f32 to vector<2x128xf32>
    %14 = arith.subf %12, %13 : vector<2x128xf32>
    %15 = arith.select %9, %7, %14 : vector<2x128xi1>, vector<2x128xf32>
    %16 = arith.truncf %15 : vector<2x128xf32> to vector<2x128xbf16>
    %c0_12 = arith.constant 0 : index
    %c0_13 = arith.constant 0 : index
    %17 = vector.load %arg6[%c0_12, %c0_13] : memref<128x256xbf16, #tpu.memory_space<vmem>>, vector<128x256xbf16>
    %cst_14 = arith.constant dense<0.000000e+00> : vector<2x256xf32>
    %18 = tpu.matmul %16, %17, %cst_14 {dimension_numbers = #tpu.dot_dimension_numbers<[1], [0], [0], [1], [0, 0, 1, 1], [], []>} : vector<2x128xbf16>, vector<128x256xbf16>, vector<2x256xf32> -> vector<2x256xf32>
    %c0_15 = arith.constant 0 : index
    %c0_16 = arith.constant 0 : index
    %19 = vector.load %arg7[%c0_15, %c0_16] : memref<1x256xf32, #tpu.memory_space<vmem>>, vector<1x256xf32>
    %20 = vector.broadcast %19 : vector<1x256xf32> to vector<2x256xf32>
    %21 = arith.addf %18, %20 : vector<2x256xf32>
    %22 = vector.extract_strided_slice %21 {offsets = [0, 0], sizes = [2, 128], strides = [1, 1]} : vector<2x256xf32> to vector<2x128xf32>
    %23 = vector.extract_strided_slice %21 {offsets = [0, 128], sizes = [2, 128], strides = [1, 1]} : vector<2x256xf32> to vector<2x128xf32>
    %24 = math.tanh %23 : vector<2x128xf32>
    %cst_17 = arith.constant 0.000000e+00 : f32
    %25 = vector.broadcast %cst_17 : f32 to vector<2x128xf32>
    %26 = arith.subf %25, %24 : vector<2x128xf32>
    %27 = math.exp %26 : vector<2x128xf32>
    %28 = arith.subf %22, %1 : vector<2x128xf32>
    %29 = arith.mulf %28, %28 : vector<2x128xf32>
    %30 = arith.mulf %29, %27 : vector<2x128xf32>
    %31 = arith.subf %22, %2 : vector<2x128xf32>
    %32 = arith.mulf %31, %31 : vector<2x128xf32>
    %33 = arith.mulf %32, %27 : vector<2x128xf32>
    %cst_18 = arith.constant 0.000000e+00 : f32
    %34 = vector.broadcast %cst_18 : f32 to vector<2x128xf32>
    %35 = arith.subf %34, %30 : vector<2x128xf32>
    %36 = arith.subf %35, %24 : vector<2x128xf32>
    %37 = arith.subf %33, %30 : vector<2x128xf32>
    %38 = vector.shape_cast %36 : vector<2x128xf32> to vector<1x2x128xf32>
    %cst_19 = arith.constant dense<0.000000e+00> : vector<1xf32>
    %39 = vector.multi_reduction <add>, %38, %cst_19 [1, 2] : vector<1x2x128xf32> to vector<1xf32>
    %40 = vector.shape_cast %39 : vector<1xf32> to vector<1x1x1xf32>
    %41 = vector.extract %40[0, 0, 0] : f32 from vector<1x1x1xf32>
    %42 = vector.shape_cast %37 : vector<2x128xf32> to vector<1x2x128xf32>
    %cst_20 = arith.constant dense<0.000000e+00> : vector<1xf32>
    %43 = vector.multi_reduction <add>, %42, %cst_20 [1, 2] : vector<1x2x128xf32> to vector<1xf32>
    %44 = vector.shape_cast %43 : vector<1xf32> to vector<1x1x1xf32>
    %45 = vector.extract %44[0, 0, 0] : f32 from vector<1x1x1xf32>
    %46 = tpu.iota {dimensions = array<i32: 1>} : vector<8x128xi32>
    %c0_i32 = arith.constant 0 : i32
    %47 = vector.broadcast %c0_i32 : i32 to vector<8x128xi32>
    %48 = arith.cmpi eq, %46, %47 : vector<8x128xi32>
    %c1_i32 = arith.constant 1 : i32
    %49 = vector.broadcast %c1_i32 : i32 to vector<8x128xi32>
    %50 = arith.cmpi eq, %46, %49 : vector<8x128xi32>
    %cst_21 = arith.constant 0.000000e+00 : f32
    %51 = vector.broadcast %45 : f32 to vector<8x128xf32>
    %52 = vector.broadcast %cst_21 : f32 to vector<8x128xf32>
    %53 = arith.select %50, %51, %52 : vector<8x128xi1>, vector<8x128xf32>
    %54 = vector.broadcast %41 : f32 to vector<8x128xf32>
    %55 = arith.select %48, %54, %53 : vector<8x128xi1>, vector<8x128xf32>
    %c0_22 = arith.constant 0 : index
    %c0_23 = arith.constant 0 : index
    %c0_24 = arith.constant 0 : index
    %56 = vector.load %arg8[%c0_22, %c0_23, %c0_24] : memref<1x8x128xf32, #tpu.memory_space<vmem>>, vector<1x8x128xf32>
    %57 = vector.shape_cast %56 : vector<1x8x128xf32> to vector<8x128xf32>
    %58 = vector.shape_cast %55 : vector<8x128xf32> to vector<1x8x128xf32>
    tpu.vector_store %arg8[%c0_22, %c0_23, %c0_24], %58 {strides = array<i32>} : memref<1x8x128xf32, #tpu.memory_space<vmem>>, vector<1x8x128xf32>,
    return
  }
  func.func @transform_0(%arg0: i32) -> (i32, i32) {
    %c0_i32 = arith.constant 0 : i32
    %c0_i32_0 = arith.constant 0 : i32
    return %arg0, %c0_i32 : i32, i32
  }
  func.func @transform_1(%arg0: i32) -> (i32, i32) {
    %c0_i32 = arith.constant 0 : i32
    %c0_i32_0 = arith.constant 0 : i32
    return %arg0, %c0_i32 : i32, i32
  }
  func.func @transform_2(%arg0: i32) -> (i32, i32) {
    %c0_i32 = arith.constant 0 : i32
    %c0_i32_0 = arith.constant 0 : i32
    return %arg0, %c0_i32 : i32, i32
  }
  func.func @transform_3(%arg0: i32) -> (i32, i32) {
    %c0_i32 = arith.constant 0 : i32
    %c0_i32_0 = arith.constant 0 : i32
    %c0_i32_1 = arith.constant 0 : i32
    return %c0_i32, %c0_i32_0 : i32, i32
  }
  func.func @transform_4(%arg0: i32) -> (i32, i32) {
    %c0_i32 = arith.constant 0 : i32
    %c0_i32_0 = arith.constant 0 : i32
    %c0_i32_1 = arith.constant 0 : i32
    return %c0_i32, %c0_i32_0 : i32, i32
  }
  func.func @transform_5(%arg0: i32) -> (i32, i32) {
    %c0_i32 = arith.constant 0 : i32
    %c0_i32_0 = arith.constant 0 : i32
    %c0_i32_1 = arith.constant 0 : i32
    return %c0_i32, %c0_i32_0 : i32, i32
  }
  func.func @transform_6(%arg0: i32) -> (i32, i32) {
    %c0_i32 = arith.constant 0 : i32
    %c0_i32_0 = arith.constant 0 : i32
    %c0_i32_1 = arith.constant 0 : i32
    return %c0_i32, %c0_i32_0 : i32, i32
  }
  func.func @transform_7(%arg0: i32) -> (i32, i32, i32) {
    %c0_i32 = arith.constant 0 : i32
    %c0_i32_0 = arith.constant 0 : i32
    %c0_i32_1 = arith.constant 0 : i32
    return %arg0, %c0_i32, %c0_i32_0 : i32, i32, i32
  }
}

</mosaic_0001>

<bundles_post_ra>
// kernel: mi_net_zc.1
= control target key start
LH: loop header
LB: loop body
LE: loop exit
PB: predicated region body
PF: predicated region fallthrough
CT: control target
= control target key end

     0   :  { %v444_v0 = vmov 0.0   ;;  %vm445_vm0 = vmmov 0   ;;  %v446_v21 = vmov 0   ;;  %v166_v39 = vlaneseq  ;;  %s577_s3 = inlined_call_operand.vmem [shape: bf16[128,128], index: 3, kind: input, shape index: {}]   ;;  %s578_s5 = inlined_call_operand.vmem [shape: bf16[128,256], index: 5, kind: input, shape index: {}]   ;;  %s579_s0 = inlined_call_operand.vmem [shape: bf16[2,128], index: 0, kind: input, shape index: {}]   ;;  %s580_s4 = inlined_call_operand.vmem [shape: f32[1,128], index: 4, kind: input, shape index: {}]   ;;  %s581_s6 = inlined_call_operand.vmem [shape: f32[1,256], index: 6, kind: input, shape index: {}]   ;;  %s582_s1 = inlined_call_operand.vmem [shape: f32[2,128], index: 1, kind: input, shape index: {}]   ;;  %s583_s2 = inlined_call_operand.vmem [shape: f32[2,128], index: 2, kind: input, shape index: {}]   ;;  %s584_s7 = inlined_call_operand.vmem [shape: f32[1,8,128], index: 7, kind: output, shape index: {}]  }
   0x1   :  { %379 = vmatprep.subr.bf16.mxu0 %v444_v0  ;;  %v406_v1 = vld [vmem:[%s577_s3 + $0x38] sm:$0xff]   ;;  %395 = vmatprep.mubr.msk.bf16.mxu0 %vm445_vm0, %v444_v0  ;;  %v407_v2 = vld [vmem:[%s577_s3 + $0x30] sm:$0xff]   ;;  %v408_v3 = vld [vmem:[%s577_s3 + $0x28] sm:$0xff]   ;;  %vm310_vm2 = vcmask 1041408  }
   0x2   :  { %380 = vmatpush3.bf16.msra.mxu0 %v406_v1  ;;  %v414_v4 = vld [vmem:[%s578_s5 + $0x74] ss:$8 sps:$4 sm:$0xff]   ;;  %v416_v5 = vld [vmem:[%s578_s5 + $0x70] ss:$8 sps:$4 sm:$0xff]   ;;  %v409_v6 = vld [vmem:[%s577_s3 + $0x20] sm:$0xff]   ;;  %288 = vmatprep.mubr.bf16.mxu1 %v446_v21  ;;  %v167_v40 = vshrl.u32 %v166_v39, 7 }
   0x3   :  { %381 = vmatprep.subr.bf16.mxu0 %v444_v0  ;;  %v417_v7 = vld [vmem:[%s578_s5 + $0x64] ss:$8 sps:$4 sm:$0xff]   ;;  %256 = vmatprep.subr.bf16.mxu1 %v414_v4  ;;  %v419_v8 = vld [vmem:[%s578_s5 + $0x60] ss:$8 sps:$4 sm:$0xff]   ;;  %v410_v9 = vld [vmem:[%s577_s3 + $0x18] sm:$0xff]  }
   0x4   :  { %257 = vmatpush1.bf16.msra.mxu1 %v416_v5  ;;  %v411_v10 = vld [vmem:[%s577_s3 + $0x10] sm:$0xff]   ;;  %v412_v11 = vld [vmem:[%s577_s3 + $0x8] sm:$0xff]   ;;  %v413_v12 = vld [vmem:[%s577_s3] sm:$0xff]   ;;  %v172_v41 = vsub.s32 1, %v167_v40  ;;  %v168_v50 = vsub.s32 0, %v167_v40 }
   0x5   :  { %258 = vmatprep.subr.bf16.mxu1 %v417_v7  ;;  %v27_v13 = vld [vmem:[%s579_s0] sm:$0x1]  ;;  %v420_v14 = vld [vmem:[%s578_s5 + $0x54] ss:$8 sps:$4 sm:$0xff]   ;;  %v422_v15 = vld [vmem:[%s578_s5 + $0x50] ss:$8 sps:$4 sm:$0xff]  }
   0x6   :  { %382 = vmatpush3.bf16.msra.mxu0 %v407_v2  ;;  %v423_v16 = vld [vmem:[%s578_s5 + $0x44] ss:$8 sps:$4 sm:$0xff]   ;;  %v425_v17 = vld [vmem:[%s578_s5 + $0x40] ss:$8 sps:$4 sm:$0xff]   ;;  %v426_v18 = vld [vmem:[%s578_s5 + $0x34] ss:$8 sps:$4 sm:$0xff]  }
   0x7   :  { %383 = vmatprep.subr.bf16.mxu0 %v444_v0  ;;  %v428_v19 = vld [vmem:[%s578_s5 + $0x30] ss:$8 sps:$4 sm:$0xff]   ;;  %v429_v20 = vld [vmem:[%s578_s5 + $0x24] ss:$8 sps:$4 sm:$0xff]   ;;  %v431_v22 = vld [vmem:[%s578_s5 + $0x20] ss:$8 sps:$4 sm:$0xff]  }
   0x8   :  { %259 = vmatpush1.bf16.msra.mxu1 %v419_v8  ;;  %v432_v23 = vld [vmem:[%s578_s5 + $0x14] ss:$8 sps:$4 sm:$0xff]   ;;  %v434_v24 = vld [vmem:[%s578_s5 + $0x10] ss:$8 sps:$4 sm:$0xff]   ;;  %v435_v25 = vld [vmem:[%s578_s5 + $0x4] ss:$8 sps:$4 sm:$0xff]  }
   0x9   :  { %260 = vmatprep.subr.bf16.mxu1 %v420_v14  ;;  %v437_v26 = vld [vmem:[%s578_s5] ss:$8 sps:$4 sm:$0xff]  }
   0xa   :  { %384 = vmatpush3.bf16.msra.mxu0 %v408_v3  ;;  %v344_v27 = vld [vmem:[%s580_s4] ss:$0 sm:$0xff] }
   0xb   :  { %385 = vmatprep.subr.bf16.mxu0 %v444_v0  ;;  %v164_v42 = vld [vmem:[%s581_s6] sm:$0x3] }
   0xc   :  { %261 = vmatpush1.bf16.msra.mxu1 %v422_v15  ;;  %v173_v43 = vrot.slane %v164_v42, %v172_v41  ;;  %v169_v53 = vrot.slane %v164_v42, %v168_v50  ;;  %v28_v55 = vld [vmem:[%s582_s1] sm:$0x3] }
   0xd   :  { %262 = vmatprep.subr.bf16.mxu1 %v423_v16  ;;  %v29_v56 = vld [vmem:[%s583_s2] sm:$0x3] }
   0xe   :  { %386 = vmatpush3.bf16.msra.mxu0 %v409_v6 }
   0xf   :  { %387 = vmatprep.subr.bf16.mxu0 %v444_v0 }
  0x10   :  { %263 = vmatpush1.bf16.msra.mxu1 %v425_v17 }
  0x11   :  { %264 = vmatprep.subr.bf16.mxu1 %v426_v18 }
  0x12   :  { %388 = vmatpush3.bf16.msra.mxu0 %v410_v9 }
  0x13   :  { %389 = vmatprep.subr.bf16.mxu0 %v444_v0 }
  0x14   :  { %265 = vmatpush1.bf16.msra.mxu1 %v428_v19  ;;  %v332_v19 = vand.u32 127, %v166_v39 }
  0x15   :  { %266 = vmatprep.subr.bf16.mxu1 %v429_v20 }
  0x16   :  { %390 = vmatpush3.bf16.msra.mxu0 %v411_v10  ;;  %vm334_vm3 = vcmp.eq.s32.totalorder %v332_v19, 1  ;;  %vm333_vm4 = vcmp.eq.s32.totalorder %v332_v19, 0 }
  0x17   :  { %391 = vmatprep.subr.bf16.mxu0 %v444_v0 }
  0x18   :  { %267 = vmatpush1.bf16.msra.mxu1 %v431_v22 }
  0x19   :  { %268 = vmatprep.subr.bf16.mxu1 %v432_v23 }
  0x1a   :  { %392 = vmatpush3.bf16.msra.mxu0 %v412_v11 }
  0x1b   :  { %393 = vmatprep.subr.bf16.mxu0 %v444_v0 }
  0x1c   :  { %269 = vmatpush1.bf16.msra.mxu1 %v434_v24 }
  0x1d   :  { %270 = vmatprep.subr.bf16.mxu1 %v435_v25 }
  0x1e   :  { %394 = vmatpush3.bf16.msra.mxu0 %v413_v12 }
  0x20   :  { %271 = vmatpush1.bf16.msra.mxu1 %v437_v26 }
  0x21   :  { %396 = vmatmul.mubr.bf16.vlgmr.msra.gmra.mxu0 %v27_v13 }
  0xe1   :  { %v135_v28 = vpop.f32.mrf.mxu0 }
  0xe2   :  { %v136_v29 = vadd.f32 %v344_v27, %v135_v28 }
  0xe3   :  { %v397_v30 = vpop.f32.mrf.mxu0 }
  0xe4   :  { %v142_v31 = vmin.f32 %v136_v29, 0.0  ;;  %vm141_vm1 = vcmp.gt.f32.partialorder %v136_v29, 0.0 }
  0xe5   :  { %v138_v32 = vpop.f32.mrf.mxu0 }
  0xe6   :  { %v143_v33 = vmul.f32 1.442695, %v142_v31 }
  0xe7   :  { %v398_v34 = vpop.f32.mrf.mxu0 }
  0xe8   :  { %438 = vpow2.f32 %v143_v33 }
  0xf5   :  { %v439_v35 = vpop.eup %438 }
  0xf6   :  { %v353_v36 = vadd.f32 -1.0, %v439_v35 }
  0xf8   :  { %v146_v37 = vsel %vm141_vm1, %v136_v29, %v353_v36 }
  0xf9   :  { %v147_v38 = vpack.c.bf16 %v146_v37, %v146_v37 }
  0xfb   :  { %289 = vmatmul.mubr.bf16.vlgmr.msra.gmra.mxu1 %v147_v38 }
 0x1bb   :  { %v290_v44 = vpop.f32.mrf.mxu1 }
 0x1bc   :  { %v291_v54 = vadd.f32 %v290_v44, %v169_v53 }
 0x1bd   :  { %v292_v45 = vpop.f32.mrf.mxu1 }
 0x1be   :  { %v293_v46 = vadd.f32 %v292_v45, %v173_v43  ;;  %v301_v57 = vsub.f32 %v291_v54, %v28_v55  ;;  %v304_v58 = vsub.f32 %v291_v54, %v29_v56 }
 0x1bf   :  { %v294_v47 = vpop.f32.mrf.mxu1 }
 0x1c0   :  { %440 = vtanh.f32 %v293_v46  ;;  %v302_v59 = vmul.f32 %v301_v57, %v301_v57  ;;  %v305_v61 = vmul.f32 %v304_v58, %v304_v58 }
 0x1c1   :  { %v295_v48 = vpop.f32.mrf.mxu1 }
 0x1cd   :  { %v441_v49 = vpop.eup %440 }
 0x1ce   :  { %v298_v51 = vsub.f32 0.0, %v441_v49 }
 0x1d0   :  { %v299_v52 = vmul.f32 1.442695, %v298_v51 }
 0x1d2   :  { %442 = vpow2.f32 %v299_v52 }
 0x1df   :  { %v443_v60 = vpop.eup %442 }
 0x1e0   :  { %v303_v62 = vmul.f32 %v443_v60, %v302_v59  ;;  %v306_v0 = vmul.f32 %v443_v60, %v305_v61 }
 0x1e2   :  { %v307_v63 = vsub.f32 0.0, %v303_v62  ;;  %v309_v3 = vsub.f32 %v306_v0, %v303_v62 }
 0x1e4   :  { %v308_v1 = vsub.f32 %v307_v63, %v441_v49  ;;  %v321_v4 = vsel %vm310_vm2, %v309_v3, 0.0 }
 0x1e6   :  { %v311_v2 = vsel %vm310_vm2, %v308_v1, 0.0 }
 0x1e7   :  { %312 = vadd.xlane.f32.xlu0 %v311_v2 }
 0x1eb   :  { %322 = vadd.xlane.f32.xlu0 %v321_v4 }
 0x270   :  { %v313_v5 = vpop.xlane.xlu0 %312 }
 0x271   :  { %v314_v6 = vrot.slane %v313_v5, 4 }
 0x273   :  { %v315_v7 = vadd.f32 %v314_v6, %v313_v5 }
 0x274   :  { %v323_v8 = vpop.xlane.xlu0 %322 }
 0x275   :  { %v316_v9 = vrot.slane %v315_v7, 2  ;;  %v324_v10 = vrot.slane %v323_v8, 4 }
 0x277   :  { %v325_v11 = vadd.f32 %v324_v10, %v323_v8  ;;  %v317_v12 = vadd.f32 %v316_v9, %v315_v7 }
 0x279   :  { %v326_v13 = vrot.slane %v325_v11, 2  ;;  %v318_v14 = vrot.slane %v317_v12, 1 }
 0x27b   :  { %v327_v15 = vadd.f32 %v326_v13, %v325_v11  ;;  %v319_v16 = vadd.f32 %v318_v14, %v317_v12 }
 0x27d   :  { %399 = vpush %v319_v16  ;;  %v328_v17 = vrot.slane %v327_v15, 1 }
 0x27f   :  { %v329_v18 = vadd.f32 %v328_v17, %v327_v15 }
 0x281   :  { %401 = vpush %v329_v18 }
 0x2ae   :  { %s400_s1 = spop %399 }
 0x2af   :  { %v337_v21 = vstv %s400_s1 }
 0x2b2   :  { %s402_s2 = spop %401 }
 0x2b3   :  { %v335_v20 = vstv %s402_s2 }
 0x2b4   :  { %v336_v22 = vsel %vm334_vm3, %v335_v20, 0.0 }
 0x2b5   :  { %v338_v23 = vsel %vm333_vm4, %v337_v21, %v336_v22 }
 0x2b6   :  { %339 = vst [vmem:[%s584_s7] sm:$0xff] %v338_v23 }

</bundles_post_ra>
